<compile_context>
chip_gen: v6e
topology: v6e:2x2x1
jax: 0.10.0
libtpu: 0.0.40
codegen_flags: <defaults>
</compile_context>

<pallas_src>
import functools

import jax
import jax.numpy as jnp
from jax import lax
from jax.experimental import pallas as pl
from jax.experimental.pallas import tpu as pltpu

NEG_SLOPE = 0.1
BN_EPS = 1e-5
OUT_CHA = [64, 64, 64, 64, 64]

# Default tile sizes (overridable; the test below passes smaller tiles so the
# gridded / partial-block / scheduled code paths are actually exercised).
ROW_TILE = 1024   # rows per MLP tile
PT_TILE = 512     # sorted-point rows per scatter-max input tile
VOX_TILE = 8      # output voxels per scatter-max output block (sublane granule)


def _leaky(x):
    return jnp.where(x > 0, x, NEG_SLOPE * x)


def _row_block(n, tile):
    """Legal row block: full extent if it fits, else `tile` (a multiple of 8)."""
    if n <= tile:
        return n
    assert tile % 8 == 0
    return tile


def _const2d(shape):
    """BlockSpec for a small 2-D parameter that stays VMEM-resident (same block
    index every grid step => Pallas skips the re-fetch)."""
    return pl.BlockSpec(shape, lambda i: (0, 0))


# ----------------------------- Pallas kernels ------------------------------

def enc_kernel(x_ref, w1_ref, b1_ref, w2_ref, b2_ref, o_ref):
    """point_enc[i] on one row tile (BN affine pre-folded into w2/b2)."""
    x = x_ref[...]
    h = _leaky(jnp.dot(x, w1_ref[...], preferred_element_type=jnp.float32)
               + b1_ref[...])
    y = jnp.dot(h, w2_ref[...], preferred_element_type=jnp.float32) + b2_ref[...]
    o_ref[...] = _leaky(y)


def ur_kernel(cur_ref, last_ref, wm_ref, bm_ref, wds_ref, wdl_ref, bd_ref,
              o_ref):
    """UR_block_forward on one row tile.  concat+Linear fused as two matmuls;
    the point_dec BatchNorm affine is pre-folded into wds/wdl/bd."""
    skip = _leaky(
        jnp.dot(cur_ref[...], wm_ref[...], preferred_element_type=jnp.float32)
        + bm_ref[...])
    f = (jnp.dot(skip, wds_ref[...], preferred_element_type=jnp.float32)
         + jnp.dot(last_ref[...], wdl_ref[...], preferred_element_type=jnp.float32)
         + bd_ref[...])
    o_ref[...] = _leaky(f)


def _scatter_max_kernel(tp, tv, starts_ref, vb_ref, tl_ref, x_ref, o_ref):
    """Sorted segment max.

    Grid step s handles (voxel block vb_ref[s], sorted point tile tl_ref[s]).
    Steps for one voxel block are consecutive, so its [tv, C] output block stays
    resident in VMEM and is max-accumulated across the point tiles it touches.
    starts_ref (SMEM) holds CSR offsets: voxel v's points occupy sorted rows
    [starts[v], starts[v+1]).  Padding steps repeat an earlier (vb, tile) pair;
    max-accumulation is idempotent so they are harmless.
    """
    s = pl.program_id(0)
    ns = pl.num_programs(0)
    vb = vb_ref[s]
    tile = tl_ref[s]
    prev_vb = vb_ref[jnp.maximum(s - 1, 0)]
    next_vb = vb_ref[jnp.minimum(s + 1, ns - 1)]
    is_first = jnp.logical_or(s == 0, prev_vb != vb)
    is_last = jnp.logical_or(s == ns - 1, next_vb != vb)

    @pl.when(is_first)
    def _():
        o_ref[...] = jnp.full(o_ref.shape, -jnp.inf, o_ref.dtype)

    x = x_ref[...]                                            # [tp, C] sorted rows
    rows = tile * tp + lax.broadcasted_iota(jnp.int32, (tp, 1), 0)  # absolute rows
    base = vb * tv
    parts = []
    for v in range(tv):                                       # tv static & small (<=8)
        lo = starts_ref[base + v]
        hi = starts_ref[base + v + 1]
        m = jnp.logical_and(rows >= lo, rows < hi)            # this voxel's rows
        parts.append(jnp.max(jnp.where(m, x, -jnp.inf), axis=0, keepdims=True))
    upd = jnp.concatenate(parts, axis=0)                      # dense [tv, C] update
    o_ref[...] = jnp.maximum(o_ref[...], upd)

    @pl.when(is_last)
    def _():
        done = o_ref[...]
        # voxels that received no points -> 0 (avoids propagating -inf/NaN
        # through the following Linear layers)
        o_ref[...] = jnp.where(done == -jnp.inf, 0.0, done)


# ----------------------------- kernel wrappers ------------------------------

def point_enc_apply(x, p, row_tile=ROW_TILE):
    n, c_in = x.shape
    c_out = p["w2"].shape[1]
    tm = _row_block(n, row_tile)
    grid = (pl.cdiv(n, tm),)
    return pl.pallas_call(
        enc_kernel,
        grid_spec=pltpu.PrefetchScalarGridSpec(
            num_scalar_prefetch=0,
            grid=grid,
            in_specs=[pl.BlockSpec((tm, c_in), lambda i: (i, 0)),
                      _const2d(p["w1"].shape), _const2d(p["b1"].shape),
                      _const2d(p["w2"].shape), _const2d(p["b2"].shape)],
            out_specs=pl.BlockSpec((tm, c_out), lambda i: (i, 0)),
        ),
        out_shape=jax.ShapeDtypeStruct((n, c_out), jnp.float32),
        compiler_params=pltpu.CompilerParams(dimension_semantics=("parallel",)),
    )(x, p["w1"], p["b1"], p["w2"], p["b2"])


def ur_apply(cur, last, p, row_tile=ROW_TILE):
    n, c_cur = cur.shape
    c_last = last.shape[1]
    c_out = p["wds"].shape[1]
    tm = _row_block(n, row_tile)
    grid = (pl.cdiv(n, tm),)
    return pl.pallas_call(
        ur_kernel,
        grid_spec=pltpu.PrefetchScalarGridSpec(
            num_scalar_prefetch=0,
            grid=grid,
            in_specs=[pl.BlockSpec((tm, c_cur), lambda i: (i, 0)),
                      pl.BlockSpec((tm, c_last), lambda i: (i, 0)),
                      _const2d(p["wm"].shape), _const2d(p["bm"].shape),
                      _const2d(p["wds"].shape), _const2d(p["wdl"].shape),
                      _const2d(p["bd"].shape)],
            out_specs=pl.BlockSpec((tm, c_out), lambda i: (i, 0)),
        ),
        out_shape=jax.ShapeDtypeStruct((n, c_out), jnp.float32),
        compiler_params=pltpu.CompilerParams(dimension_semantics=("parallel",)),
    )(cur, last, p["wm"], p["bm"], p["wds"], p["wdl"], p["bd"])


def scatter_max(x, idx, n_out, pt_tile=PT_TILE, vox_tile=VOX_TILE):
    """torch_scatter.scatter_max(x, idx, dim=0) -> [n_out, C] via sorted segments."""
    n, c = x.shape
    n_out = int(n_out)
    idx = idx.astype(jnp.int32)

    # --- JAX glue: sort points by voxel id so each voxel is a contiguous segment
    order = jnp.argsort(idx)
    x_sorted = jnp.take(x, order, axis=0)
    idx_sorted = jnp.take(idx, order)

    tp = _row_block(n, pt_tile)
    tv = vox_tile if n_out >= vox_tile else n_out
    n_ptile = pl.cdiv(n, tp)
    n_vblk = pl.cdiv(n_out, tv)
    n_vpad = n_vblk * tv

    # CSR offsets, padded so phantom voxels (>= n_out) are empty segments.
    starts = jnp.searchsorted(
        idx_sorted, jnp.arange(n_vpad + 1, dtype=jnp.int32)).astype(jnp.int32)

    # Static-length schedule: one grid step per (voxel block, point tile)
    # incidence.  sum(steps) <= n_vblk + n_ptile - 1; padding repeats the last
    # pair (idempotent under max).  Tile indices are clamped so empty/phantom
    # voxel blocks can never produce an out-of-range input block index.
    blk_lo = starts[0:n_vpad:tv]           # [n_vblk] first sorted row of block
    blk_hi = starts[tv:n_vpad + 1:tv]      # [n_vblk] exclusive end
    t_lo = jnp.minimum(blk_lo // tp, n_ptile - 1)
    t_hi = jnp.clip(jnp.maximum((blk_hi - 1) // tp, t_lo), 0, n_ptile - 1)
    cnt = t_hi - t_lo + 1                  # >= 1 step per voxel block
    csum = jnp.cumsum(cnt)
    n_steps = n_vblk + n_ptile - 1         # static upper bound
    sids = jnp.arange(n_steps, dtype=jnp.int32)
    vb_of_step = jnp.minimum(jnp.searchsorted(csum, sids, side="right"),
                             n_vblk - 1).astype(jnp.int32)
    base = jnp.where(vb_of_step > 0, csum[vb_of_step - 1], 0)
    tl_of_step = jnp.clip(t_lo[vb_of_step] + (sids - base),
                          t_lo[vb_of_step], t_hi[vb_of_step]).astype(jnp.int32)

    kernel = functools.partial(_scatter_max_kernel, tp, tv)
    return pl.pallas_call(
        kernel,
        grid_spec=pltpu.PrefetchScalarGridSpec(
            num_scalar_prefetch=3,   # starts, vb_of_step, tl_of_step -> SMEM
            grid=(n_steps,),
            in_specs=[pl.BlockSpec((tp, c), lambda s, st, vb, tl: (tl[s], 0))],
            out_specs=pl.BlockSpec((tv, c), lambda s, st, vb, tl: (vb[s], 0)),
        ),
        out_shape=jax.ShapeDtypeStruct((n_out, c), jnp.float32),
        compiler_params=pltpu.CompilerParams(dimension_semantics=("arbitrary",)),
    )(starts, vb_of_step, tl_of_step, x_sorted)


# ----------------------------- parameter init -------------------------------

def _init_linear(key, fan_in, fan_out):
    k1, k2 = jax.random.split(key)
    bound = 1.0 / jnp.sqrt(jnp.float32(fan_in))
    w = jax.random.uniform(k1, (fan_in, fan_out), jnp.float32, -bound, bound)
    b = jax.random.uniform(k2, (1, fan_out), jnp.float32, -bound, bound)
    return w, b


def _init_bn_folded(key, c):
    """Eval-mode BatchNorm1d folded into per-channel scale/shift."""
    k1, k2, k3, k4 = jax.random.split(key, 4)
    gamma = jax.random.uniform(k1, (1, c), jnp.float32, 0.5, 1.5)
    beta = 0.1 * jax.random.normal(k2, (1, c), jnp.float32)
    mean = 0.1 * jax.random.normal(k3, (1, c), jnp.float32)
    var = jax.random.uniform(k4, (1, c), jnp.float32, 0.5, 1.5)
    g = gamma / jnp.sqrt(var + BN_EPS)
    return g, beta - mean * g


def init_pe_block(key, in_channels, scale, num_classes):
    keys = iter(jax.random.split(key, 128))
    params = {"enc": [], "ur": []}

    # point_enc
    in_c = in_channels
    for i in range(scale + 1):
        w1, b1 = _init_linear(next(keys), in_c, OUT_CHA[i] // 2)
        g, be = _init_bn_folded(next(keys), OUT_CHA[i] // 2)
        w2, b2 = _init_linear(next(keys), OUT_CHA[i] // 2, OUT_CHA[i])
        params["enc"].append(dict(w1=w1, b1=b1, g=g, beta=be, w2=w2, b2=b2))
        in_c = OUT_CHA[i]

    # MLP[i] + point_dec[i] fused per UR block
    in_c = OUT_CHA[-1]
    for i in range(scale + 1):
        cha = OUT_CHA[-1 - i]
        wm, bm = _init_linear(next(keys), cha, cha)
        wd, bd = _init_linear(next(keys), in_c + cha, cha)
        g, be = _init_bn_folded(next(keys), cha)
        params["ur"].append(dict(wm=wm, bm=bm,
                                 wd_skip=wd[:cha], wd_last=wd[cha:],
                                 bd=bd, g=g, beta=be))
        in_c = cha

    # classifier (defined in __init__ but NOT used by forward) -- init for parity
    wc1, bc1 = _init_linear(next(keys), OUT_CHA[0] * 2, OUT_CHA[0])
    wc2, bc2 = _init_linear(next(keys), OUT_CHA[0], num_classes)
    params["classifier"] = dict(w1=wc1, b1=bc1, w2=wc2, b2=bc2)
    return params


def fold_params(params):
    """Fold the eval-mode BN affines into the adjacent Linear weights/biases.

    point_enc:  (leaky(x@w1+b1)*g + beta) @ w2 + b2
              == leaky(x@w1+b1) @ (w2 * g^T) + (beta @ w2 + b2)
    point_dec:  (skip@Wd_s + last@Wd_l + bd)*g + beta
              == skip@(Wd_s*g) + last@(Wd_l*g) + (bd*g + beta)
    """
    enc_f = []
    for p in params["enc"]:
        w2f = p["w2"] * jnp.reshape(p["g"], (-1, 1))
        b2f = p["beta"] @ p["w2"] + p["b2"]
        enc_f.append(dict(w1=p["w1"], b1=p["b1"], w2=w2f, b2=b2f))
    ur_f = []
    for p in params["ur"]:
        ur_f.append(dict(wm=p["wm"], bm=p["bm"],
                         wds=p["wd_skip"] * p["g"],
                         wdl=p["wd_last"] * p["g"],
                         bd=p["bd"] * p["g"] + p["beta"]))
    return {"enc": enc_f, "ur": ur_f}


# ----------------------------- forward pass ---------------------------------

def pe_block_forward(params, data_dict, row_tile=ROW_TILE,
                     pt_tile=PT_TILE, vox_tile=VOX_TILE):
    fp = fold_params(params)   # BN folded into Linear weights (once, outside kernels)

    pt_fea = data_dict["pt_fea"]
    s2, s4, s8, s16 = (data_dict["scale_2"], data_dict["scale_4"],
                       data_dict["scale_8"], data_dict["scale_16"])

    def enc(x, p):
        return point_enc_apply(x, p, row_tile)

    def smax(x, s):
        return scatter_max(x, s["coors_inv"], s["num_voxels"], pt_tile, vox_tile)

    def ur(cur, last, p):
        return ur_apply(cur, last, p, row_tile)

    p1_en = enc(pt_fea, fp["enc"][0])
    out = smax(p1_en, s2)
    p2_en = enc(out, fp["enc"][1])
    out = smax(p2_en, s4)
    p3_en = enc(out, fp["enc"][2])
    out = smax(p3_en, s8)
    p4_en = enc(out, fp["enc"][3])
    out = smax(p4_en, s16)
    p5_en = enc(out, fp["enc"][4])

    p5_feat = ur(p5_en, p5_en, fp["ur"][0])
    out = jnp.take(p5_feat, s16["coors_inv"], axis=0)   # glue: gather to finer scale
    p4_feat = ur(p4_en, out, fp["ur"][1])
    out = jnp.take(p4_feat, s8["coors_inv"], axis=0)
    p3_feat = ur(p3_en, out, fp["ur"][2])
    out = jnp.take(p3_feat, s4["coors_inv"], axis=0)
    p2_feat = ur(p2_en, out, fp["ur"][3])
    out = jnp.take(p2_feat, s2["coors_inv"], axis=0)
    p1_feat = ur(p1_en, out, fp["ur"][4])

    data_dict["pfeat_scale1"] = p1_feat
    data_dict["pfeat_scale2"] = p2_feat
    data_dict["pfeat_scale4"] = p3_feat
    data_dict["pfeat_scale8"] = p4_feat
    data_dict["pfeat_scale16"] = p5_feat
    return data_dict


# ----------------------------- pure-JAX reference ---------------------------

def ref_forward(params, data_dict):
    def enc(x, p):
        h = _leaky(x @ p["w1"] + p["b1"]) * p["g"] + p["beta"]
        return _leaky(h @ p["w2"] + p["b2"])

    def smax(x, idx, n):
        out = jax.ops.segment_max(x, idx, num_segments=n)
        return jnp.where(jnp.isneginf(out), 0.0, out)   # untouched voxels -> 0

    def ur(cur, last, p):
        skip = _leaky(cur @ p["wm"] + p["bm"])
        f = skip @ p["wd_skip"] + last @ p["wd_last"] + p["bd"]
        return _leaky(f * p["g"] + p["beta"])

    pt_fea = data_dict["pt_fea"]
    s2, s4, s8, s16 = (data_dict["scale_2"], data_dict["scale_4"],
                       data_dict["scale_8"], data_dict["scale_16"])

    p1_en = enc(pt_fea, params["enc"][0])
    out = smax(p1_en, s2["coors_inv"], s2["num_voxels"])
    p2_en = enc(out, params["enc"][1])
    out = smax(p2_en, s4["coors_inv"], s4["num_voxels"])
    p3_en = enc(out, params["enc"][2])
    out = smax(p3_en, s8["coors_inv"], s8["num_voxels"])
    p4_en = enc(out, params["enc"][3])
    out = smax(p4_en, s16["coors_inv"], s16["num_voxels"])
    p5_en = enc(out, params["enc"][4])

    p5_feat = ur(p5_en, p5_en, params["ur"][0])
    out = p5_feat[s16["coors_inv"]]
    p4_feat = ur(p4_en, out, params["ur"][1])
    out = p4_feat[s8["coors_inv"]]
    p3_feat = ur(p3_en, out, params["ur"][2])
    out = p3_feat[s4["coors_inv"]]
    p2_feat = ur(p2_en, out, params["ur"][3])
    out = p2_feat[s2["coors_inv"]]
    p1_feat = ur(p1_en, out, params["ur"][4])

    return {"pfeat_scale1": p1_feat, "pfeat_scale2": p2_feat,
            "pfeat_scale4": p3_feat, "pfeat_scale8": p4_feat,
            "pfeat_scale16": p5_feat}


# ----------------------------- main ------------------------------------------

if __name__ == "__main__":
    key = jax.random.PRNGKey(0)
    in_channels, scale, num_classes = 16, 4, 13
    # points / voxels at scales 1, 2, 4, 8, 16 -- small, but chosen so the
    # gridded kernels see multi-tile grids, partial blocks and multi-block
    # scatter schedules.
    Ns = [200, 64, 20, 8, 4]

    kp, kx, ki = jax.random.split(key, 3)
    params = init_pe_block(kp, in_channels, scale, num_classes)
    pt_fea = jax.random.normal(kx, (Ns[0], in_channels), jnp.float32)

    # Build coors_inv maps (fine -> coarse) guaranteeing every coarse voxel is hit.
    data_dict = {"pt_fea": pt_fea}
    inv_keys = jax.random.split(ki, 8)
    for s, name in enumerate(["scale_2", "scale_4", "scale_8", "scale_16"]):
        n_fine, n_coarse = Ns[s], Ns[s + 1]
        base = jnp.arange(n_coarse, dtype=jnp.int32)
        extra = jax.random.randint(inv_keys[2 * s], (n_fine - n_coarse,),
                                   0, n_coarse, jnp.int32)
        idx = jax.random.permutation(inv_keys[2 * s + 1],
                                     jnp.concatenate([base, extra]))
        data_dict[name] = {"coors_inv": idx, "num_voxels": n_coarse}

    # Small tiles so the tiled / scheduled code paths are exercised at test size.
    out_dict = pe_block_forward(params, data_dict,
                                row_tile=64, pt_tile=64, vox_tile=8)
    jax.block_until_ready(out_dict)

    ref = ref_forward(params, data_dict)
    for k, v in ref.items():
        assert jnp.allclose(out_dict[k], v, atol=1e-4, rtol=1e-4), k

    print("KERNEL_OK")
</pallas_src>

<mosaic_0001>
module attributes {stable_mosaic.version = 11 : i64} {
  func.func @enc_kernel(%arg0: i32, %arg1: memref<64x16xf32, #tpu.memory_space<vmem>>, %arg2: memref<16x32xf32, #tpu.memory_space<vmem>>, %arg3: memref<1x32xf32, #tpu.memory_space<vmem>>, %arg4: memref<32x64xf32, #tpu.memory_space<vmem>>, %arg5: memref<1x64xf32, #tpu.memory_space<vmem>>, %arg6: memref<64x64xf32, #tpu.memory_space<vmem>>) attributes {dimension_semantics = [#tpu.dimension_semantics<parallel>], iteration_bounds = array<i64: 4>, scalar_prefetch = 0 : i64, scratch_operands = 0 : i64, tpu.core_type = #tpu.core_type<tc>, window_params = [{transform_indices = @transform_0, window_bounds = array<i64: 64, 16>}, {pipeline_mode = #tpu.pipeline_mode<synchronous>, transform_indices = @transform_1, window_bounds = array<i64: 16, 32>}, {pipeline_mode = #tpu.pipeline_mode<synchronous>, transform_indices = @transform_2, window_bounds = array<i64: 1, 32>}, {pipeline_mode = #tpu.pipeline_mode<synchronous>, transform_indices = @transform_3, window_bounds = array<i64: 32, 64>}, {pipeline_mode = #tpu.pipeline_mode<synchronous>, transform_indices = @transform_4, window_bounds = array<i64: 1, 64>}, {transform_indices = @transform_5, window_bounds = array<i64: 64, 64>}]} {
    %c0 = arith.constant 0 : index
    %c0_0 = arith.constant 0 : index
    %0 = vector.load %arg1[%c0, %c0_0] : memref<64x16xf32, #tpu.memory_space<vmem>>, vector<64x16xf32>
    %c0_1 = arith.constant 0 : index
    %c0_2 = arith.constant 0 : index
    %1 = vector.load %arg2[%c0_1, %c0_2] : memref<16x32xf32, #tpu.memory_space<vmem>>, vector<16x32xf32>
    %cst = arith.constant dense<0.000000e+00> : vector<64x32xf32>
    %2 = tpu.matmul %0, %1, %cst {dimension_numbers = #tpu.dot_dimension_numbers<[1], [0], [0], [1], [0, 0, 1, 1], [], []>} : vector<64x16xf32>, vector<16x32xf32>, vector<64x32xf32> -> vector<64x32xf32>
    %c0_3 = arith.constant 0 : index
    %c0_4 = arith.constant 0 : index
    %3 = vector.load %arg3[%c0_3, %c0_4] : memref<1x32xf32, #tpu.memory_space<vmem>>, vector<1x32xf32>
    %4 = vector.broadcast %3 : vector<1x32xf32> to vector<64x32xf32>
    %5 = arith.addf %2, %4 : vector<64x32xf32>
    %cst_5 = arith.constant 0.000000e+00 : f32
    %6 = vector.broadcast %cst_5 : f32 to vector<64x32xf32>
    %7 = arith.cmpf ogt, %5, %6 : vector<64x32xf32>
    %cst_6 = arith.constant 1.000000e-01 : f32
    %8 = vector.broadcast %cst_6 : f32 to vector<64x32xf32>
    %9 = arith.mulf %8, %5 : vector<64x32xf32>
    %10 = arith.select %7, %5, %9 : vector<64x32xi1>, vector<64x32xf32>
    %c0_7 = arith.constant 0 : index
    %c0_8 = arith.constant 0 : index
    %11 = vector.load %arg4[%c0_7, %c0_8] : memref<32x64xf32, #tpu.memory_space<vmem>>, vector<32x64xf32>
    %cst_9 = arith.constant dense<0.000000e+00> : vector<64x64xf32>
    %12 = tpu.matmul %10, %11, %cst_9 {dimension_numbers = #tpu.dot_dimension_numbers<[1], [0], [0], [1], [0, 0, 1, 1], [], []>} : vector<64x32xf32>, vector<32x64xf32>, vector<64x64xf32> -> vector<64x64xf32>
    %c0_10 = arith.constant 0 : index
    %c0_11 = arith.constant 0 : index
    %13 = vector.load %arg5[%c0_10, %c0_11] : memref<1x64xf32, #tpu.memory_space<vmem>>, vector<1x64xf32>
    %14 = vector.broadcast %13 : vector<1x64xf32> to vector<64x64xf32>
    %15 = arith.addf %12, %14 : vector<64x64xf32>
    %cst_12 = arith.constant 0.000000e+00 : f32
    %16 = vector.broadcast %cst_12 : f32 to vector<64x64xf32>
    %17 = arith.cmpf ogt, %15, %16 : vector<64x64xf32>
    %cst_13 = arith.constant 1.000000e-01 : f32
    %18 = vector.broadcast %cst_13 : f32 to vector<64x64xf32>
    %19 = arith.mulf %18, %15 : vector<64x64xf32>
    %20 = arith.select %17, %15, %19 : vector<64x64xi1>, vector<64x64xf32>
    %c0_14 = arith.constant 0 : index
    %c0_15 = arith.constant 0 : index
    %21 = vector.load %arg6[%c0_14, %c0_15] : memref<64x64xf32, #tpu.memory_space<vmem>>, vector<64x64xf32>
    tpu.vector_store %arg6[%c0_14, %c0_15], %20 {strides = array<i32>} : memref<64x64xf32, #tpu.memory_space<vmem>>, vector<64x64xf32>,
    return
  }
  func.func @transform_0(%arg0: i32) -> (i32, i32) {
    %c0_i32 = arith.constant 0 : i32
    %c0_i32_0 = arith.constant 0 : i32
    return %arg0, %c0_i32 : i32, i32
  }
  func.func @transform_1(%arg0: i32) -> (i32, i32) {
    %c0_i32 = arith.constant 0 : i32
    %c0_i32_0 = arith.constant 0 : i32
    %c0_i32_1 = arith.constant 0 : i32
    return %c0_i32, %c0_i32_0 : i32, i32
  }
  func.func @transform_2(%arg0: i32) -> (i32, i32) {
    %c0_i32 = arith.constant 0 : i32
    %c0_i32_0 = arith.constant 0 : i32
    %c0_i32_1 = arith.constant 0 : i32
    return %c0_i32, %c0_i32_0 : i32, i32
  }
  func.func @transform_3(%arg0: i32) -> (i32, i32) {
    %c0_i32 = arith.constant 0 : i32
    %c0_i32_0 = arith.constant 0 : i32
    %c0_i32_1 = arith.constant 0 : i32
    return %c0_i32, %c0_i32_0 : i32, i32
  }
  func.func @transform_4(%arg0: i32) -> (i32, i32) {
    %c0_i32 = arith.constant 0 : i32
    %c0_i32_0 = arith.constant 0 : i32
    %c0_i32_1 = arith.constant 0 : i32
    return %c0_i32, %c0_i32_0 : i32, i32
  }
  func.func @transform_5(%arg0: i32) -> (i32, i32) {
    %c0_i32 = arith.constant 0 : i32
    %c0_i32_0 = arith.constant 0 : i32
    return %arg0, %c0_i32 : i32, i32
  }
}

</mosaic_0001>

<bundles_post_ra>
// kernel: tpu_custom_call.1
= control target key start
LH: loop header
LB: loop body
LE: loop exit
PB: predicated region body
PF: predicated region fallthrough
CT: control target
= control target key end

     0   :  { %s1144_s18 = smov 0   ;;  %s1146_s19 = smov 0   ;;  %s1301_s0 = inlined_call_operand.vmem [shape: f32[200,16], index: 0, kind: input, shape index: {}]   ;;  %s1302_s1 = inlined_call_operand.vmem [shape: f32[16,32], index: 1, kind: input, shape index: {}]   ;;  %s1303_s2 = inlined_call_operand.vmem [shape: f32[1,32], index: 2, kind: input, shape index: {}]   ;;  %s1304_s3 = inlined_call_operand.vmem [shape: f32[32,64], index: 3, kind: input, shape index: {}]   ;;  %s1305_s4 = inlined_call_operand.vmem [shape: f32[1,64], index: 4, kind: input, shape index: {}]   ;;  %s1306_s5 = inlined_call_operand.vmem [shape: f32[200,64], index: 5, kind: output, shape index: {}]  }
   0x1   :  { %s1148_s20 = smov 0  }
   0x2 LB: > { %s1157_s21 = sadd.s32 4294967295, %s1080_s20   ;;  %s1159_s22 = sadd.s32 1, %s1080_s20   ;;  %s1080_s20 = sphi %s1148_s20, %s1313_s20   ;;  %s1076_s19 = sphi %s1146_s19, %s1312_s19   ;;  %s1072_s18 = sphi %s1144_s18, %s1311_s18  }
   0x3   : > { %s129_s23 = ssub.s32 %s1080_s20, %s1159_s22  ;;  %s132_s24 = sadd.s32 1, %s1076_s19 }
   0x4   : > { %p130_p0 = scmp.eq.s32.totalorder %s129_s23, 0  ;;  %p142_p1 = scmp.ne.s32.totalorder %s1076_s19, %s1072_s18 }
   0x5   : > { %p143_p2 = scmp.eq.s32.totalorder %s1157_s21, 3  ;;  %p838_p3 = scmp.ge.s32.totalorder %s1080_s20, 1 }
   0x6   : > { %s1167_s25 = scalar_select %p130_p0, %s1076_s19, %s132_s24  }
   0x7   : > { %p1169_p4 = por %p143_p2, %p142_p1  ;;  %p196_p5 = scmp.lt.s32.totalorder %s1080_s20, 5 }
   0x9   : > { %p197_p6 = pnand %p838_p3, %p196_p5 }
   0xa   : > { %s1180_s6 = sshll.u32 (!%p197_p6), %s1157_s21, 3  ;;  %s224_s28 = sand.u32 (!%p197_p6), 1, %s1072_s18  }
   0xb   : > { %200 = sbr.rel (%p197_p6) target bundleno = 475 (0x1db), region = 40  ;;  %p232_p7 = scmp.lt.s32.totalorder (!%p197_p6), %s1180_s6, 24 }
  0x10   : > { %v255_v0 = vld [vmem:[%s1302_s1 + $0x8] sm:$0xff]  ;;  %v254_v1 = vld [vmem:[%s1302_s1] sm:$0xff]  ;;  %s233_s7 = scalar_select %p232_p7, %s1180_s6, 24  ;;  %vm263_vm0 = vcmask 130048   ;;  %v420_v10 = vld [vmem:[%s1304_s3 + $0x18] sm:$0xff]  ;;  %vm428_vm1 = vcmask 261120  }
  0x11   : > { %902 = vmatprep.subr.mxu0 %v255_v0  ;;  %918 = vmatprep.subr.mxu1 %v420_v10  ;;  %v419_v11 = vld [vmem:[%s1304_s3 + $0x10] sm:$0xff]  ;;  %v418_v12 = vld [vmem:[%s1304_s3 + $0x8] sm:$0xff]  ;;  %v417_v13 = vld [vmem:[%s1304_s3] sm:$0xff]  ;;  %vm582_vm11 = vcmask 523264   ;;  %s599_s18 = ssub.s32 (%p1169_p4), 25, %s1180_s6  ;;  %s877_s9 = sshll.u32 (%p1169_p4), %s1157_s21, 6 }
  0x12   : > { %903 = vmatpush3.msra.mxu0 %v255_v0  ;;  %s841_s8 = sshll.u32 %s233_s7, 3  ;;  %919 = vmatpush3.msra.mxu1 %v420_v10  ;;  %v842_v14 = vld [vmem:[%s1303_s2] ss:$0 sm:$0xff]  ;;  %s839_s7 = sshll.u32 %s224_s28, 6 }
  0x13   : > { %904 = vmatprep.subr.mxu0 %v254_v1  ;;  %s235_s11 = scalar_lea.vmem %s1301_s0, %s841_s8  ;;  %920 = vmatprep.subr.mxu1 %v419_v11  ;;  %v851_v47 = vld [vmem:[%s1305_s4] ss:$0 sm:$0xff]  ;;  %s1222_s8 = scalar_lea.vmem [#allocation2], %s839_s7  }
  0x14   : > { %905 = vmatpush3.msra.mxu0 %v254_v1  ;;  %v246_v2 = vld [vmem:[%s235_s11] sm:$0xff]  ;;  %v247_v3 = vld [vmem:[%s235_s11 + $0x8] sm:$0xff]  ;;  %v248_v4 = vld [vmem:[%s235_s11 + $0x10] sm:$0xff]  ;;  %921 = vmatpush3.msra.mxu1 %v419_v11  ;;  %p600_p8 = scmp.lt.s32.totalorder (%p1169_p4), %s599_s18, 8  ;;  %s1247_s12 = scalar_lea.vmem (%p1169_p4), %s1306_s5, %s877_s9  }
  0x15   : > { %906 = vmatprep.mubr.msk.f32.mxu0 %vm263_vm0, %v246_v2  ;;  %v249_v5 = vld [vmem:[%s235_s11 + $0x18] sm:$0xff]  ;;  %v250_v6 = vld [vmem:[%s235_s11 + $0x20] sm:$0xff]  ;;  %v251_v7 = vld [vmem:[%s235_s11 + $0x28] sm:$0xff]  ;;  %922 = vmatprep.subr.mxu1 %v418_v12 }
  0x16   : > { %907 = vmatmul.mubr.msk.f32.vlgmr.msra.gmra.mxu0 %vm263_vm0, %v247_v3  ;;  %v252_v8 = vld [vmem:[%s235_s11 + $0x30] sm:$0xff]  ;;  %v253_v9 = vld [vmem:[%s235_s11 + $0x38] sm:$0xff]  ;;  %923 = vmatpush3.msra.mxu1 %v418_v12 }
  0x17   : > { %909 = vmatprep.mubr.msk.f32.mxu0 %vm263_vm0, %v248_v4  ;;  %924 = vmatprep.subr.mxu1 %v417_v13 }
  0x18   : > { %925 = vmatpush3.msra.mxu1 %v417_v13 }
  0x1a   : > { %910 = vmatmul.mubr.msk.f32.gmra.mxu0 %vm263_vm0, %v249_v5 }
  0x1b   : > { %912 = vmatprep.mubr.msk.f32.mxu0 %vm263_vm0, %v250_v6 }
  0x1e   : > { %913 = vmatmul.mubr.msk.f32.gmra.mxu0 %vm263_vm0, %v251_v7 }
  0x1f   : > { %915 = vmatprep.mubr.msk.f32.mxu0 %vm263_vm0, %v252_v8 }
  0x22   : > { %916 = vmatmul.mubr.msk.f32.gmra.mxu0 %vm263_vm0, %v253_v9 }
  0xd6   : > { %v908_v15 = vpop.f32.mrf.mxu0 }
  0xd7   : > { %v360_v16 = vadd.f32 %v908_v15, %v842_v14 }
  0xd8   : > { %v354_v17 = vpop.f32.mrf.mxu0 }
  0xd9   : > { %v355_v18 = vadd.f32 %v842_v14, %v354_v17  ;;  %v402_v19 = vmul.f32 0.1, %v360_v16  ;;  %vm394_vm2 = vcmp.gt.f32.partialorder %v360_v16, 0.0 }
  0xda   : > { %v911_v20 = vpop.f32.mrf.mxu0 }
  0xdb   : > { %v370_v21 = vadd.f32 %v911_v20, %v842_v14  ;;  %vm393_vm3 = vcmp.gt.f32.partialorder %v355_v18, 0.0  ;;  %v401_v22 = vmul.f32 0.1, %v355_v18  ;;  %v410_v28 = vsel %vm394_vm2, %v360_v16, %v402_v19 }
  0xdc   : > { %v364_v23 = vpop.f32.mrf.mxu0 }
  0xdd   : > { %v365_v24 = vadd.f32 %v842_v14, %v364_v23  ;;  %v409_v25 = vsel %vm393_vm3, %v355_v18, %v401_v22  ;;  %v404_v26 = vmul.f32 0.1, %v370_v21  ;;  %vm396_vm4 = vcmp.gt.f32.partialorder %v370_v21, 0.0 }
  0xde   : > { %v914_v27 = vpop.f32.mrf.mxu0  ;;  %926 = vmatprep.mubr.msk.f32.mxu1 %vm428_vm1, %v409_v25 }
  0xdf   : > { %vm395_vm5 = vcmp.gt.f32.partialorder %v365_v24, 0.0  ;;  %v403_v29 = vmul.f32 0.1, %v365_v24  ;;  %v380_v30 = vadd.f32 %v914_v27, %v842_v14  ;;  %927 = vmatmul.mubr.msk.f32.vlgmr.msra.gmra.mxu1 %vm428_vm1, %v410_v28  ;;  %v412_v36 = vsel %vm396_vm4, %v370_v21, %v404_v26 }
  0xe0   : > { %v374_v31 = vpop.f32.mrf.mxu0 }
  0xe1   : > { %v375_v32 = vadd.f32 %v842_v14, %v374_v31  ;;  %v411_v33 = vsel %vm395_vm5, %v365_v24, %v403_v29  ;;  %v406_v34 = vmul.f32 0.1, %v380_v30  ;;  %vm398_vm6 = vcmp.gt.f32.partialorder %v380_v30, 0.0 }
  0xe2   : > { %v917_v35 = vpop.f32.mrf.mxu0  ;;  %929 = vmatprep.mubr.msk.f32.mxu1 %vm428_vm1, %v411_v33 }
  0xe3   : > { %vm397_vm7 = vcmp.gt.f32.partialorder %v375_v32, 0.0  ;;  %v405_v37 = vmul.f32 0.1, %v375_v32  ;;  %v390_v38 = vadd.f32 %v917_v35, %v842_v14  ;;  %930 = vmatmul.mubr.msk.f32.gmra.mxu1 %vm428_vm1, %v412_v36  ;;  %v414_v43 = vsel %vm398_vm6, %v380_v30, %v406_v34 }
  0xe4   : > { %v384_v39 = vpop.f32.mrf.mxu0 }
  0xe5   : > { %v385_v40 = vadd.f32 %v842_v14, %v384_v39  ;;  %v413_v41 = vsel %vm397_vm7, %v375_v32, %v405_v37  ;;  %v408_v42 = vmul.f32 0.1, %v390_v38  ;;  %vm400_vm8 = vcmp.gt.f32.partialorder %v390_v38, 0.0 }
  0xe6   : > { %932 = vmatprep.mubr.msk.f32.mxu1 %vm428_vm1, %v413_v41 }
  0xe7   : > { %vm399_vm9 = vcmp.gt.f32.partialorder %v385_v40, 0.0  ;;  %v407_v44 = vmul.f32 0.1, %v385_v40  ;;  %933 = vmatmul.mubr.msk.f32.gmra.mxu1 %vm428_vm1, %v414_v43  ;;  %v416_v46 = vsel %vm400_vm8, %v390_v38, %v408_v42 }
  0xe9   : > { %v415_v45 = vsel %vm399_vm9, %v385_v40, %v407_v44 }
  0xea   : > { %935 = vmatprep.mubr.msk.f32.mxu1 %vm428_vm1, %v415_v45 }
  0xeb   : > { %936 = vmatmul.mubr.msk.f32.gmra.mxu1 %vm428_vm1, %v416_v46 }
 0x19f   : > { %v928_v48 = vpop.f32.mrf.mxu1 }
 0x1a0   : > { %v525_v49 = vadd.f32 %v928_v48, %v851_v47 }
 0x1a1   : > { %v519_v50 = vpop.f32.mrf.mxu1 }
 0x1a2   : > { %vm559_vm10 = vcmp.gt.f32.partialorder %v525_v49, 0.0  ;;  %v567_v51 = vmul.f32 0.1, %v525_v49  ;;  %v520_v52 = vadd.f32 %v851_v47, %v519_v50 }
 0x1a3   : > { %v931_v53 = vpop.f32.mrf.mxu1 }
 0x1a4   : > { %v575_v54 = vsel %vm559_vm10, %v525_v49, %v567_v51  ;;  %vm558_vm12 = vcmp.gt.f32.partialorder %v520_v52, 0.0  ;;  %v566_v55 = vmul.f32 0.1, %v520_v52  ;;  %v535_v56 = vadd.f32 %v931_v53, %v851_v47 }
 0x1a5   : > { %584 = vst.msk [vmem:[%s1222_s8 + $0x8] sm:$0xff] %vm582_vm11, %v575_v54  ;;  %v529_v57 = vpop.f32.mrf.mxu1 }
 0x1a6   : > { %v574_v58 = vsel %vm558_vm12, %v520_v52, %v566_v55  ;;  %vm561_vm13 = vcmp.gt.f32.partialorder %v535_v56, 0.0  ;;  %v569_v59 = vmul.f32 0.1, %v535_v56  ;;  %v530_v60 = vadd.f32 %v851_v47, %v529_v57 }
 0x1a7   : > { %583 = vst.msk [vmem:[%s1222_s8] sm:$0xff] %vm582_vm11, %v574_v58  ;;  %v934_v61 = vpop.f32.mrf.mxu1 }
 0x1a8   : > { %v577_v62 = vsel %vm561_vm13, %v535_v56, %v569_v59  ;;  %vm560_vm14 = vcmp.gt.f32.partialorder %v530_v60, 0.0  ;;  %v568_v63 = vmul.f32 0.1, %v530_v60  ;;  %v545_v0 = vadd.f32 %v934_v61, %v851_v47 }
 0x1a9   : > { %586 = vst.msk [vmem:[%s1222_s8 + $0x18] sm:$0xff] %vm582_vm11, %v577_v62  ;;  %v539_v1 = vpop.f32.mrf.mxu1 }
 0x1aa   : > { %v576_v2 = vsel %vm560_vm14, %v530_v60, %v568_v63  ;;  %vm563_vm15 = vcmp.gt.f32.partialorder %v545_v0, 0.0  ;;  %v571_v3 = vmul.f32 0.1, %v545_v0  ;;  %v540_v4 = vadd.f32 %v851_v47, %v539_v1 }
 0x1ab   : > { %585 = vst.msk [vmem:[%s1222_s8 + $0x10] sm:$0xff] %vm582_vm11, %v576_v2  ;;  %v937_v5 = vpop.f32.mrf.mxu1 }
 0x1ac   : > { %v579_v6 = vsel %vm563_vm15, %v545_v0, %v571_v3  ;;  %vm562_vm0 = vcmp.gt.f32.partialorder %v540_v4, 0.0  ;;  %v570_v7 = vmul.f32 0.1, %v540_v4  ;;  %v555_v8 = vadd.f32 %v937_v5, %v851_v47 }
 0x1ad   : > { %588 = vst.msk [vmem:[%s1222_s8 + $0x28] sm:$0xff] %vm582_vm11, %v579_v6  ;;  %v549_v9 = vpop.f32.mrf.mxu1 }
 0x1ae   : > { %v578_v10 = vsel %vm562_vm0, %v540_v4, %v570_v7  ;;  %vm565_vm1 = vcmp.gt.f32.partialorder %v555_v8, 0.0  ;;  %v573_v11 = vmul.f32 0.1, %v555_v8  ;;  %v550_v12 = vadd.f32 %v851_v47, %v549_v9 }
 0x1af   : > { %587 = vst.msk [vmem:[%s1222_s8 + $0x20] sm:$0xff] %vm582_vm11, %v578_v10  ;;  %597 = sbr.rel (!%p1169_p4) target bundleno = 475 (0x1db), region = 44 }
 0x1b0   : > { %v581_v13 = vsel %vm565_vm1, %v555_v8, %v573_v11  ;;  %vm564_vm2 = vcmp.gt.f32.partialorder %v550_v12, 0.0  ;;  %v572_v14 = vmul.f32 0.1, %v550_v12 }
 0x1b1   : > { %590 = vst.msk [vmem:[%s1222_s8 + $0x38] sm:$0xff] %vm582_vm11, %v581_v13 }
 0x1b2   : > { %v580_v15 = vsel %vm564_vm2, %v550_v12, %v572_v14 }
 0x1b3   : > { %589 = vst.msk [vmem:[%s1222_s8 + $0x30] sm:$0xff] %vm582_vm11, %v580_v15 }
 0x1b4   : > { %s1315_s18 = smov (!%p600_p8, %s599_s18), 8 }
 0x1b5   : > { %s862_s13 = sshll.u32 %s1315_s18, 7 }
 0x1b6   : > { %p865_p9 = scmp.eq.s32.totalorder %s862_s13, 0 }
 0x1b7   : > { %s1253_s14 = sshrl.u32 (!%p865_p9), %s1315_s18, 3 }
 0x1b8   : > { %608 = sbr.rel (%p865_p9) target bundleno = 475 (0x1db), region = 48  ;;  %p866_p10 = scmp.le.s32.totalorder (!%p865_p9), %s1253_s14, 0 }
 0x1bd   : > { %791 = sbr.rel (%p866_p10) target bundleno = 458 (0x1ca), region = 124  ;;  %s1308_s21 = smov (!%p866_p10), %s1247_s12 }
 0x1be   : > { %s1309_s26 = smov (!%p866_p10), %s1222_s8  ;;  %s1262_s6 = smov (!%p866_p10), 0  }
 0x1bf   : > { %s1264_s15 = smov (!%p866_p10), 0  }
 0x1c2 LB: >> { %v685_v16 = vld [vmem:[%s1088_s26] sm:$0xff]  ;;  %v687_v17 = vld [vmem:[%s1088_s26 + $0x8] sm:$0xff]  ;;  %v689_v18 = vld [vmem:[%s1088_s26 + $0x10] sm:$0xff]  ;;  %s701_s16 = sadd.s32 1, %s1092_s6  ;;  %s679_s15 = sadd.s32 1, %s1096_s15   ;;  %s1096_s15 = sphi %s1264_s15, %s679_s15   ;;  %s1092_s6 = sphi %s1262_s6, %s1310_s6   ;;  %s1088_s26 = sphi %s1309_s26, %s706_s26   ;;  %s1084_s21 = sphi %s1308_s21, %s707_s21  }
 0x1c3   : >> { %686 = vst [vmem:[%s1084_s21] sm:$0xff] %v685_v16  ;;  %688 = vst [vmem:[%s1084_s21 + $0x8] sm:$0xff] %v687_v17  ;;  %v691_v19 = vld [vmem:[%s1088_s26 + $0x18] sm:$0xff]  ;;  %v693_v20 = vld [vmem:[%s1088_s26 + $0x20] sm:$0xff]  ;;  %p702_p11 = scmp.ge.s32.totalorder %s701_s16, %s1253_s14  ;;  %p678_p12 = scmp.ge.s32.totalorder %s679_s15, %s1253_s14 }
 0x1c4   : >> { %690 = vst [vmem:[%s1084_s21 + $0x10] sm:$0xff] %v689_v18  ;;  %v695_v21 = vld [vmem:[%s1088_s26 + $0x28] sm:$0xff]  ;;  %692 = vst [vmem:[%s1084_s21 + $0x18] sm:$0xff] %v691_v19  ;;  %v697_v22 = vld [vmem:[%s1088_s26 + $0x30] sm:$0xff] }
 0x1c5   : >> { %694 = vst [vmem:[%s1084_s21 + $0x20] sm:$0xff] %v693_v20  ;;  %696 = vst [vmem:[%s1084_s21 + $0x28] sm:$0xff] %v695_v21  ;;  %v699_v23 = vld [vmem:[%s1088_s26 + $0x38] sm:$0xff]  ;;  %s1317_s16 = smov (%p702_p11, %s701_s16), 0  ;;  %681 = sbr.rel (!%p678_p12) target bundleno = 450 (0x1c2), region = 130 }
 0x1c6   : >> { %698 = vst [vmem:[%s1084_s21 + $0x30] sm:$0xff] %v697_v22  ;;  %700 = vst [vmem:[%s1084_s21 + $0x38] sm:$0xff] %v699_v23  ;;  %s867_s17 = sshll.u32 %s1317_s16, 6  ;;  %s1310_s6 = smov %s1317_s16 }
 0x1c7   : >> { %s706_s26 = scalar_lea.vmem %s1222_s8, %s867_s17 [#allocation2]   ;;  %s707_s21 = scalar_lea.vmem %s1247_s12, %s867_s17  }
 0x1ca PF: > { %s1283_s20 = sand.u32 7, %s1315_s18   ;;  %s878_s23 = sshll.u32 %s1253_s14, 6 }
 0x1cb   : > { %s712_s24 = scalar_lea.vmem %s1222_s8, %s878_s23 [#allocation2]   ;;  %s714_s27 = scalar_lea.vmem %s1247_s12, %s878_s23  }
 0x1cc   : > { %p872_p13 = scmp.le.s32.totalorder %s1283_s20, 0 }
 0x1cd   : > { %s1098_s28 = smov (!%p872_p13), %s714_s27   ;;  %s1102_s29 = smov (!%p872_p13), %s712_s24  }
 0x1ce   : > { %805 = sbr.rel (%p872_p13) target bundleno = 475 (0x1db), region = 135  ;;  %s1106_s30 = smov (!%p872_p13), 0  }
 0x1cf   : > { %s1110_s7 = smov (!%p872_p13), 0  }
 0x1d3 LB: >> { %v724_v24 = vld [vmem:[%s1104_s29] sm:$0xff]  ;;  %s726_s18 = sadd.s32 1, %s1108_s30  ;;  %s718_s7 = sadd.s32 1, %s1112_s7   ;;  %s1112_s7 = sphi %s1110_s7, %s718_s7   ;;  %s1108_s30 = sphi %s1106_s30, %s1107_s30   ;;  %s1104_s29 = sphi %s1102_s29, %s731_s29   ;;  %s1100_s28 = sphi %s1098_s28, %s732_s28  }
 0x1d4   : >> { %725 = vst [vmem:[%s1100_s28] sm:$0xff] %v724_v24  ;;  %p727_p0 = scmp.ge.s32.totalorder %s726_s18, %s1283_s20  ;;  %p717_p1 = scmp.ge.s32.totalorder %s718_s7, %s1283_s20 }
 0x1d6   : >> { %s1319_s18 = smov (%p727_p0, %s726_s18), 0  ;;  %720 = sbr.rel (!%p717_p1) target bundleno = 467 (0x1d3), region = 141 }
 0x1d7   : >> { %s873_s8 = sshll.u32 %s1319_s18, 3  ;;  %s1107_s30 = smov %s1319_s18  }
 0x1d8   : >> { %s731_s29 = scalar_lea.vmem %s712_s24, %s873_s8 [#allocation2]   ;;  %s732_s28 = scalar_lea.vmem %s714_s27, %s873_s8  }
 0x1db PF: > { %p12_p2 = scmp.ge.s32.totalorder %s1159_s22, 6   ;;  %s1311_s18 = smov %s1076_s19 }
 0x1dc   : > { %s1312_s19 = smov %s1167_s25  ;;  %s1313_s20 = smov %s1159_s22 }
 0x1dd   :  { %14 = sbr.rel (!%p12_p2) target bundleno = 2 (0x2), region = 152 }

</bundles_post_ra>
